<compile_context>
chip_gen: v5e
topology: v5e:2x2
jax: 0.10.0
libtpu: 0.0.40
codegen_flags: <defaults>
</compile_context>

<pallas_src>
import jax
import jax.numpy as jnp
from jax.experimental import pallas as pl
from jax.experimental.pallas import tpu as pltpu

IN_CHANNELS = 28 * 28   # 784
MID_CHANNELS = 64


def _glow_block_kernel(x_ref, w1_ref, b1_ref, w2_ref, b2_ref, o_ref):
    # hidden = relu(x @ W1 + b1)  -- MXU matmul, f32 accumulation.
    h = jnp.dot(x_ref[...], w1_ref[...], preferred_element_type=jnp.float32)
    h = jnp.maximum(h + b1_ref[...].astype(jnp.float32), 0.0)
    # out = hidden @ W2 + b2.  The cast to the weight dtype is standard mixed
    # precision (bf16 weights -> bf16 LHS); keep h in f32 here if accuracy
    # ever regresses — the MXU accepts an f32 LHS and this kernel is
    # mem-bound, so the extra MXU passes are free.
    out = jnp.dot(h.astype(w2_ref.dtype), w2_ref[...],
                  preferred_element_type=jnp.float32)
    out = out + b2_ref[...].astype(jnp.float32)
    o_ref[...] = out.astype(o_ref.dtype)


def _round_up(x, m):
    return ((x + m - 1) // m) * m


def glow_block(x, w1, b1, w2, b2, *, block_b=1024):
    """Fused Linear->ReLU->Linear.

    x:  (B, C_in)        -- pass bf16 for the production path (f32 also OK)
    w1: (C_in, C_mid)    (= W1.T in PyTorch terms)
    b1: (1, C_mid)
    w2: (C_mid, C_in)    (= W2.T)
    b2: (1, C_in)
    block_b: max batch tile.  1024 is a good default everywhere (vmem_limit
             is raised automatically so it also fits v5e); bf16 callers can
             go to 2048 on v6e/v7x.
    """
    B, C_in = x.shape
    C_mid = w1.shape[1]
    assert w1.shape == (C_in, C_mid)
    assert b1.shape == (1, C_mid)
    assert w2.shape == (C_mid, C_in)
    assert b2.shape == (1, C_in)

    # Batch tile: multiple of 8 (sublane), capped so the grid has >= ~4 steps
    # when B is large enough (feeds both v7x TensorCores and warms the
    # pipeline), and never much larger than B itself.  No padding of x: the
    # final tile may be partial (Pallas masks out-of-bounds output stores).
    tb = min(block_b, _round_up(-(-B // 4), 8), _round_up(B, 8))
    tb = max(tb, 8)
    grid = (pl.cdiv(B, tb),)

    x_itemsize = jnp.dtype(x.dtype).itemsize
    w_itemsize = jnp.dtype(w1.dtype).itemsize
    w_elems = w1.size + w2.size + b1.size + b2.size

    # VMEM budget: x + out tiles double-buffered, weights single-buffered.
    vmem_needed = 2 * tb * C_in * (2 * x_itemsize) + w_elems * w_itemsize
    vmem_limit = min(max(vmem_needed + (4 << 20), 32 << 20), 64 << 20)

    cost = pl.CostEstimate(
        flops=2 * B * C_in * C_mid * 2,                 # two matmuls
        transcendentals=0,
        bytes_accessed=2 * B * C_in * x_itemsize        # x + out (exact, no pad)
        + w_elems * w_itemsize,
    )

    return pl.pallas_call(
        _glow_block_kernel,
        out_shape=jax.ShapeDtypeStruct((B, C_in), x.dtype),
        grid_spec=pltpu.PrefetchScalarGridSpec(
            num_scalar_prefetch=0,
            grid=grid,
            in_specs=[
                # x: one batch tile per grid step (double-buffered pipeline).
                pl.BlockSpec((tb, C_in), lambda i: (i, 0)),
                # Weights / biases: constant block index -> fetched once;
                # single buffer suffices (saves VMEM for larger x/out tiles).
                pl.BlockSpec((C_in, C_mid), lambda i: (0, 0),
                             pipeline_mode=pl.Buffered(1)),
                pl.BlockSpec((1, C_mid), lambda i: (0, 0),
                             pipeline_mode=pl.Buffered(1)),
                pl.BlockSpec((C_mid, C_in), lambda i: (0, 0),
                             pipeline_mode=pl.Buffered(1)),
                pl.BlockSpec((1, C_in), lambda i: (0, 0),
                             pipeline_mode=pl.Buffered(1)),
            ],
            out_specs=pl.BlockSpec((tb, C_in), lambda i: (i, 0)),
        ),
        compiler_params=pltpu.CompilerParams(
            # Batch tiles are independent -> shard grid steps across TCs (v7x).
            dimension_semantics=("parallel",),
            vmem_limit_bytes=int(vmem_limit),
        ),
        cost_estimate=cost,
    )(x, w1, b1, w2, b2)


def init_params(key, c_in, c_mid, dtype=jnp.float32):
    """Deterministic init mirroring nn.Linear: U(-1/sqrt(fan_in), 1/sqrt(fan_in))."""
    k1, k2, k3, k4 = jax.random.split(key, 4)
    lim1 = 1.0 / jnp.sqrt(jnp.float32(c_in))
    lim2 = 1.0 / jnp.sqrt(jnp.float32(c_mid))
    w1 = jax.random.uniform(k1, (c_in, c_mid), dtype, -lim1, lim1)   # (in, mid) = W1.T
    b1 = jax.random.uniform(k2, (1, c_mid), dtype, -lim1, lim1)
    w2 = jax.random.uniform(k3, (c_mid, c_in), dtype, -lim2, lim2)   # (mid, in) = W2.T
    b2 = jax.random.uniform(k4, (1, c_in), dtype, -lim2, lim2)
    return w1, b1, w2, b2


def glow_block_ref(x, w1, b1, w2, b2):
    h = jnp.maximum(x @ w1 + b1, 0.0)
    return h @ w2 + b2


if __name__ == "__main__":
    key = jax.random.PRNGKey(0)
    kx, kp, kx2 = jax.random.split(key, 3)

    # ---- Small f32 smoke test (single tile, tight tolerance) ----
    batch = 8
    x = jax.random.normal(kx, (batch, IN_CHANNELS), dtype=jnp.float32)
    w1, b1, w2, b2 = init_params(kp, IN_CHANNELS, MID_CHANNELS)

    out = jax.block_until_ready(glow_block(x, w1, b1, w2, b2))
    ref = glow_block_ref(x, w1, b1, w2, b2)
    assert out.shape == (batch, IN_CHANNELS)
    assert jnp.allclose(out, ref, atol=1e-4, rtol=1e-4), "f32 mismatch vs JAX reference"

    # ---- Ragged batch: multi-step grid with a partial final tile, no wrapper
    #      pad / slice (B=300, tile=80 -> grid=(4,), last tile 60 valid rows) ----
    batch2 = 300
    x2 = jax.random.normal(kx2, (batch2, IN_CHANNELS), dtype=jnp.float32)
    out2 = jax.block_until_ready(glow_block(x2, w1, b1, w2, b2, block_b=128))
    ref2 = glow_block_ref(x2, w1, b1, w2, b2)
    assert out2.shape == (batch2, IN_CHANNELS)
    assert jnp.allclose(out2, ref2, atol=1e-4, rtol=1e-4), "ragged-batch f32 mismatch"

    # ---- bf16 production path (halves HBM bytes; f32 accumulation inside) ----
    xb = x.astype(jnp.bfloat16)
    w1b, b1b, w2b, b2b = (a.astype(jnp.bfloat16) for a in (w1, b1, w2, b2))
    outb = jax.block_until_ready(glow_block(xb, w1b, b1b, w2b, b2b))
    assert outb.dtype == jnp.bfloat16
    assert jnp.allclose(outb.astype(jnp.float32), ref, atol=5e-2, rtol=5e-2), \
        "bf16 mismatch vs f32 reference"

    print("KERNEL_OK")
</pallas_src>

<mosaic_0001>
module attributes {stable_mosaic.version = 11 : i64} {
  func.func @_glow_block_kernel(%arg0: i32, %arg1: memref<8x784xf32, #tpu.memory_space<vmem>>, %arg2: memref<784x64xf32, #tpu.memory_space<vmem>>, %arg3: memref<1x64xf32, #tpu.memory_space<vmem>>, %arg4: memref<64x784xf32, #tpu.memory_space<vmem>>, %arg5: memref<1x784xf32, #tpu.memory_space<vmem>>, %arg6: memref<8x784xf32, #tpu.memory_space<vmem>>) attributes {dimension_semantics = [#tpu.dimension_semantics<parallel>], iteration_bounds = array<i64: 1>, scalar_prefetch = 0 : i64, scratch_operands = 0 : i64, tpu.core_type = #tpu.core_type<tc>, window_params = [{transform_indices = @transform_0, window_bounds = array<i64: 8, 784>}, {pipeline_mode = #tpu.pipeline_mode<synchronous>, transform_indices = @transform_1, window_bounds = array<i64: 784, 64>}, {pipeline_mode = #tpu.pipeline_mode<synchronous>, transform_indices = @transform_2, window_bounds = array<i64: 1, 64>}, {pipeline_mode = #tpu.pipeline_mode<synchronous>, transform_indices = @transform_3, window_bounds = array<i64: 64, 784>}, {pipeline_mode = #tpu.pipeline_mode<synchronous>, transform_indices = @transform_4, window_bounds = array<i64: 1, 784>}, {transform_indices = @transform_5, window_bounds = array<i64: 8, 784>}]} {
    %c0 = arith.constant 0 : index
    %c0_0 = arith.constant 0 : index
    %0 = vector.load %arg1[%c0, %c0_0] : memref<8x784xf32, #tpu.memory_space<vmem>>, vector<8x784xf32>
    %c0_1 = arith.constant 0 : index
    %c0_2 = arith.constant 0 : index
    %1 = vector.load %arg2[%c0_1, %c0_2] : memref<784x64xf32, #tpu.memory_space<vmem>>, vector<784x64xf32>
    %cst = arith.constant dense<0.000000e+00> : vector<8x64xf32>
    %2 = tpu.matmul %0, %1, %cst {dimension_numbers = #tpu.dot_dimension_numbers<[1], [0], [0], [1], [0, 0, 1, 1], [], []>} : vector<8x784xf32>, vector<784x64xf32>, vector<8x64xf32> -> vector<8x64xf32>
    %c0_3 = arith.constant 0 : index
    %c0_4 = arith.constant 0 : index
    %3 = vector.load %arg3[%c0_3, %c0_4] : memref<1x64xf32, #tpu.memory_space<vmem>>, vector<1x64xf32>
    %4 = vector.broadcast %3 : vector<1x64xf32> to vector<8x64xf32>
    %5 = arith.addf %2, %4 : vector<8x64xf32>
    %cst_5 = arith.constant 0.000000e+00 : f32
    %6 = vector.broadcast %cst_5 : f32 to vector<8x64xf32>
    %7 = arith.maximumf %5, %6 : vector<8x64xf32>
    %c0_6 = arith.constant 0 : index
    %c0_7 = arith.constant 0 : index
    %8 = vector.load %arg4[%c0_6, %c0_7] : memref<64x784xf32, #tpu.memory_space<vmem>>, vector<64x784xf32>
    %cst_8 = arith.constant dense<0.000000e+00> : vector<8x784xf32>
    %9 = tpu.matmul %7, %8, %cst_8 {dimension_numbers = #tpu.dot_dimension_numbers<[1], [0], [0], [1], [0, 0, 1, 1], [], []>} : vector<8x64xf32>, vector<64x784xf32>, vector<8x784xf32> -> vector<8x784xf32>
    %c0_9 = arith.constant 0 : index
    %c0_10 = arith.constant 0 : index
    %10 = vector.load %arg5[%c0_9, %c0_10] : memref<1x784xf32, #tpu.memory_space<vmem>>, vector<1x784xf32>
    %11 = vector.broadcast %10 : vector<1x784xf32> to vector<8x784xf32>
    %12 = arith.addf %9, %11 : vector<8x784xf32>
    %c0_11 = arith.constant 0 : index
    %c0_12 = arith.constant 0 : index
    %13 = vector.load %arg6[%c0_11, %c0_12] : memref<8x784xf32, #tpu.memory_space<vmem>>, vector<8x784xf32>
    tpu.vector_store %arg6[%c0_11, %c0_12], %12 {strides = array<i32>} : memref<8x784xf32, #tpu.memory_space<vmem>>, vector<8x784xf32>,
    return
  }
  func.func @transform_0(%arg0: i32) -> (i32, i32) {
    %c0_i32 = arith.constant 0 : i32
    %c0_i32_0 = arith.constant 0 : i32
    return %arg0, %c0_i32 : i32, i32
  }
  func.func @transform_1(%arg0: i32) -> (i32, i32) {
    %c0_i32 = arith.constant 0 : i32
    %c0_i32_0 = arith.constant 0 : i32
    %c0_i32_1 = arith.constant 0 : i32
    return %c0_i32, %c0_i32_0 : i32, i32
  }
  func.func @transform_2(%arg0: i32) -> (i32, i32) {
    %c0_i32 = arith.constant 0 : i32
    %c0_i32_0 = arith.constant 0 : i32
    %c0_i32_1 = arith.constant 0 : i32
    return %c0_i32, %c0_i32_0 : i32, i32
  }
  func.func @transform_3(%arg0: i32) -> (i32, i32) {
    %c0_i32 = arith.constant 0 : i32
    %c0_i32_0 = arith.constant 0 : i32
    %c0_i32_1 = arith.constant 0 : i32
    return %c0_i32, %c0_i32_0 : i32, i32
  }
  func.func @transform_4(%arg0: i32) -> (i32, i32) {
    %c0_i32 = arith.constant 0 : i32
    %c0_i32_0 = arith.constant 0 : i32
    %c0_i32_1 = arith.constant 0 : i32
    return %c0_i32, %c0_i32_0 : i32, i32
  }
  func.func @transform_5(%arg0: i32) -> (i32, i32) {
    %c0_i32 = arith.constant 0 : i32
    %c0_i32_0 = arith.constant 0 : i32
    return %arg0, %c0_i32 : i32, i32
  }
}

</mosaic_0001>

<bundles_post_ra>
// kernel: tpu_custom_call.1
= control target key start
LH: loop header
LB: loop body
LE: loop exit
PB: predicated region body
PF: predicated region fallthrough
CT: control target
= control target key end

     0   :  { %s1082_s0 = inlined_call_operand.vmem [shape: f32[8,784], index: 0, kind: input, shape index: {}]   ;;  %s1083_s1 = inlined_call_operand.vmem [shape: f32[784,64], index: 1, kind: input, shape index: {}]   ;;  %s1084_s2 = inlined_call_operand.vmem [shape: f32[1,64], index: 2, kind: input, shape index: {}]   ;;  %s1085_s3 = inlined_call_operand.vmem [shape: f32[64,784], index: 3, kind: input, shape index: {}]   ;;  %s1086_s4 = inlined_call_operand.vmem [shape: f32[1,784], index: 4, kind: input, shape index: {}]   ;;  %s1087_s5 = inlined_call_operand.hbm [shape: f32[8,784], index: 5, kind: output, shape index: {}]  }
   0x1   :  { %v43_v0 = vld [vmem:[%s1083_s1 + $0x78] sm:$0xff]  ;;  %v42_v1 = vld [vmem:[%s1083_s1 + $0x70] sm:$0xff]  ;;  %v41_v4 = vld [vmem:[%s1083_s1 + $0x68] sm:$0xff] }
   0x2   :  { %v59_v2 = vld [vmem:[%s1083_s1 + $0xf8] sm:$0xff]  ;;  %134 = vmatpush.msra.mxu0 %v43_v0  ;;  %v58_v3 = vld [vmem:[%s1083_s1 + $0xf0] sm:$0xff]  ;;  %v57_v5 = vld [vmem:[%s1083_s1 + $0xe8] sm:$0xff] }
   0x3   :  { %154 = vmatpush.msra.mxu1 %v59_v2  ;;  %v40_v6 = vld [vmem:[%s1083_s1 + $0x60] sm:$0xff]  ;;  %v39_v8 = vld [vmem:[%s1083_s1 + $0x58] sm:$0xff]  ;;  %v38_v10 = vld [vmem:[%s1083_s1 + $0x50] sm:$0xff] }
   0x4   :  { %135 = vmatpush.msra.mxu0 %v42_v1  ;;  %v56_v7 = vld [vmem:[%s1083_s1 + $0xe0] sm:$0xff]  ;;  %v55_v9 = vld [vmem:[%s1083_s1 + $0xd8] sm:$0xff]  ;;  %v54_v12 = vld [vmem:[%s1083_s1 + $0xd0] sm:$0xff] }
   0x5   :  { %155 = vmatpush.msra.mxu1 %v58_v3  ;;  %v75_v11 = vld [vmem:[%s1083_s1 + $0x178] sm:$0xff]  ;;  %v74_v13 = vld [vmem:[%s1083_s1 + $0x170] sm:$0xff]  ;;  %v73_v15 = vld [vmem:[%s1083_s1 + $0x168] sm:$0xff] }
   0x6   :  { %136 = vmatpush.msra.mxu0 %v41_v4  ;;  %174 = vmatpush.msra.mxu2 %v75_v11  ;;  %v91_v14 = vld [vmem:[%s1083_s1 + $0x1f8] sm:$0xff]  ;;  %v90_v16 = vld [vmem:[%s1083_s1 + $0x1f0] sm:$0xff]  ;;  %v37_v17 = vld [vmem:[%s1083_s1 + $0x48] sm:$0xff] }
   0x7   :  { %156 = vmatpush.msra.mxu1 %v57_v5  ;;  %v53_v18 = vld [vmem:[%s1083_s1 + $0xc8] sm:$0xff]  ;;  %194 = vmatpush.msra.mxu3 %v91_v14  ;;  %v72_v19 = vld [vmem:[%s1083_s1 + $0x160] sm:$0xff]  ;;  %v71_v23 = vld [vmem:[%s1083_s1 + $0x158] sm:$0xff] }
   0x8   :  { %137 = vmatpush.msra.mxu0 %v40_v6  ;;  %175 = vmatpush.msra.mxu2 %v74_v13  ;;  %v89_v20 = vld [vmem:[%s1083_s1 + $0x1e8] sm:$0xff]  ;;  %v36_v21 = vld [vmem:[%s1083_s1 + $0x40] sm:$0xff]  ;;  %v35_v25 = vld [vmem:[%s1083_s1 + $0x38] sm:$0xff] }
   0x9   :  { %157 = vmatpush.msra.mxu1 %v56_v7  ;;  %v52_v22 = vld [vmem:[%s1083_s1 + $0xc0] sm:$0xff]  ;;  %195 = vmatpush.msra.mxu3 %v90_v16  ;;  %v51_v26 = vld [vmem:[%s1083_s1 + $0xb8] sm:$0xff]  ;;  %v70_v27 = vld [vmem:[%s1083_s1 + $0x150] sm:$0xff] }
   0xa   :  { %138 = vmatpush.msra.mxu0 %v39_v8  ;;  %176 = vmatpush.msra.mxu2 %v73_v15  ;;  %v88_v24 = vld [vmem:[%s1083_s1 + $0x1e0] sm:$0xff]  ;;  %v87_v28 = vld [vmem:[%s1083_s1 + $0x1d8] sm:$0xff]  ;;  %v34_v29 = vld [vmem:[%s1083_s1 + $0x30] sm:$0xff] }
   0xb   :  { %158 = vmatpush.msra.mxu1 %v55_v9  ;;  %196 = vmatpush.msra.mxu3 %v89_v20  ;;  %v50_v30 = vld [vmem:[%s1083_s1 + $0xb0] sm:$0xff]  ;;  %v69_v31 = vld [vmem:[%s1083_s1 + $0x148] sm:$0xff]  ;;  %v68_v35 = vld [vmem:[%s1083_s1 + $0x140] sm:$0xff] }
   0xc   :  { %139 = vmatpush.msra.mxu0 %v38_v10  ;;  %177 = vmatpush.msra.mxu2 %v72_v19  ;;  %v86_v32 = vld [vmem:[%s1083_s1 + $0x1d0] sm:$0xff]  ;;  %v33_v33 = vld [vmem:[%s1083_s1 + $0x28] sm:$0xff]  ;;  %v32_v37 = vld [vmem:[%s1083_s1 + $0x20] sm:$0xff] }
   0xd   :  { %159 = vmatpush.msra.mxu1 %v54_v12  ;;  %197 = vmatpush.msra.mxu3 %v88_v24  ;;  %v49_v34 = vld [vmem:[%s1083_s1 + $0xa8] sm:$0xff]  ;;  %v48_v38 = vld [vmem:[%s1083_s1 + $0xa0] sm:$0xff]  ;;  %v67_v39 = vld [vmem:[%s1083_s1 + $0x138] sm:$0xff] }
   0xe   :  { %140 = vmatpush.msra.mxu0 %v37_v17  ;;  %178 = vmatpush.msra.mxu2 %v71_v23  ;;  %v85_v36 = vld [vmem:[%s1083_s1 + $0x1c8] sm:$0xff]  ;;  %v84_v40 = vld [vmem:[%s1083_s1 + $0x1c0] sm:$0xff]  ;;  %v31_v41 = vld [vmem:[%s1083_s1 + $0x18] sm:$0xff] }
   0xf   :  { %160 = vmatpush.msra.mxu1 %v53_v18  ;;  %198 = vmatpush.msra.mxu3 %v87_v28  ;;  %v47_v42 = vld [vmem:[%s1083_s1 + $0x98] sm:$0xff]  ;;  %v66_v43 = vld [vmem:[%s1083_s1 + $0x130] sm:$0xff]  ;;  %v65_v47 = vld [vmem:[%s1083_s1 + $0x128] sm:$0xff] }
  0x10   :  { %141 = vmatpush.msra.mxu0 %v36_v21  ;;  %179 = vmatpush.msra.mxu2 %v70_v27  ;;  %v83_v44 = vld [vmem:[%s1083_s1 + $0x1b8] sm:$0xff]  ;;  %v30_v45 = vld [vmem:[%s1083_s1 + $0x10] sm:$0xff]  ;;  %v29_v49 = vld [vmem:[%s1083_s1 + $0x8] sm:$0xff] }
  0x11   :  { %161 = vmatpush.msra.mxu1 %v52_v22  ;;  %199 = vmatpush.msra.mxu3 %v86_v32  ;;  %v46_v46 = vld [vmem:[%s1083_s1 + $0x90] sm:$0xff]  ;;  %v45_v50 = vld [vmem:[%s1083_s1 + $0x88] sm:$0xff]  ;;  %v64_v51 = vld [vmem:[%s1083_s1 + $0x120] sm:$0xff] }
  0x12   :  { %142 = vmatpush.msra.mxu0 %v35_v25  ;;  %180 = vmatpush.msra.mxu2 %v69_v31  ;;  %v82_v48 = vld [vmem:[%s1083_s1 + $0x1b0] sm:$0xff]  ;;  %v81_v52 = vld [vmem:[%s1083_s1 + $0x1a8] sm:$0xff]  ;;  %v28_v53 = vld [vmem:[%s1083_s1] sm:$0xff] }
  0x13   :  { %162 = vmatpush.msra.mxu1 %v51_v26  ;;  %200 = vmatpush.msra.mxu3 %v85_v36  ;;  %v44_v54 = vld [vmem:[%s1083_s1 + $0x80] sm:$0xff]  ;;  %v107_v55 = vld [vmem:[%s1083_s1 + $0x278] sm:$0xff]  ;;  %v106_v59 = vld [vmem:[%s1083_s1 + $0x270] sm:$0xff] }
  0x14   :  { %143 = vmatpush.msra.mxu0 %v34_v29  ;;  %181 = vmatpush.msra.mxu2 %v68_v35  ;;  %v123_v56 = vld [vmem:[%s1083_s1 + $0x2f8] sm:$0xff]  ;;  %v80_v58 = vld [vmem:[%s1083_s1 + $0x1a0] sm:$0xff]  ;;  %v122_v60 = vld [vmem:[%s1083_s1 + $0x2f0] sm:$0xff] }
  0x15   :  { %163 = vmatpush.msra.mxu1 %v50_v30  ;;  %201 = vmatpush.msra.mxu3 %v84_v40  ;;  %v63_v57 = vld [vmem:[%s1083_s1 + $0x118] sm:$0xff]  ;;  %v62_v61 = vld [vmem:[%s1083_s1 + $0x110] sm:$0xff]  ;;  %v105_v63 = vld [vmem:[%s1083_s1 + $0x268] sm:$0xff] }
  0x16   :  { %144 = vmatpush.msra.mxu0 %v33_v33  ;;  %182 = vmatpush.msra.mxu2 %v67_v39  ;;  %v79_v62 = vld [vmem:[%s1083_s1 + $0x198] sm:$0xff]  ;;  %v121_v0 = vld [vmem:[%s1083_s1 + $0x2e8] sm:$0xff]  ;;  %v78_v2 = vld [vmem:[%s1083_s1 + $0x190] sm:$0xff] }
  0x17   :  { %164 = vmatpush.msra.mxu1 %v49_v34  ;;  %202 = vmatpush.msra.mxu3 %v83_v44  ;;  %v61_v1 = vld [vmem:[%s1083_s1 + $0x108] sm:$0xff]  ;;  %v104_v3 = vld [vmem:[%s1083_s1 + $0x260] sm:$0xff]  ;;  %v103_v7 = vld [vmem:[%s1083_s1 + $0x258] sm:$0xff] }
  0x18   :  { %145 = vmatpush.msra.mxu0 %v32_v37  ;;  %183 = vmatpush.msra.mxu2 %v66_v43  ;;  %v120_v4 = vld [vmem:[%s1083_s1 + $0x2e0] sm:$0xff]  ;;  %v77_v6 = vld [vmem:[%s1083_s1 + $0x188] sm:$0xff]  ;;  %v119_v8 = vld [vmem:[%s1083_s1 + $0x2d8] sm:$0xff] }
  0x19   :  { %165 = vmatpush.msra.mxu1 %v48_v38  ;;  %203 = vmatpush.msra.mxu3 %v82_v48  ;;  %v60_v5 = vld [vmem:[%s1083_s1 + $0x100] sm:$0xff]  ;;  %v23_v9 = vld [vmem:[%s1082_s0 + $0x10] sm:$0xff] }
  0x1a   :  { %146 = vmatpush.msra.mxu0 %v31_v41  ;;  %184 = vmatpush.msra.mxu2 %v65_v47  ;;  %v76_v10 = vld [vmem:[%s1083_s1 + $0x180] sm:$0xff] }
  0x1b   :  { %166 = vmatpush.msra.mxu1 %v47_v42  ;;  %204 = vmatpush.msra.mxu3 %v81_v52 }
  0x1c   :  { %147 = vmatpush.msra.mxu0 %v30_v45  ;;  %185 = vmatpush.msra.mxu2 %v64_v51 }
  0x1d   :  { %167 = vmatpush.msra.mxu1 %v46_v46  ;;  %205 = vmatpush.msra.mxu3 %v80_v58 }
  0x1e   :  { %148 = vmatpush.msra.mxu0 %v29_v49  ;;  %186 = vmatpush.msra.mxu2 %v63_v57 }
  0x1f   :  { %168 = vmatpush.msra.mxu1 %v45_v50  ;;  %206 = vmatpush.msra.mxu3 %v79_v62 }
  0x20   :  { %149 = vmatpush.msra.mxu0 %v28_v53  ;;  %187 = vmatpush.msra.mxu2 %v62_v61 }
  0x21   :  { %169 = vmatpush.msra.mxu1 %v44_v54  ;;  %207 = vmatpush.msra.mxu3 %v78_v2 }
  0x22   :  { %214 = vmatpush.msrb.mxu0 %v107_v55  ;;  %188 = vmatpush.msra.mxu2 %v61_v1 }
  0x23   :  { %234 = vmatpush.msrb.mxu1 %v123_v56 }
  0x24   :  { %215 = vmatpush.msrb.mxu0 %v106_v59 }
  0x25   :  { %235 = vmatpush.msrb.mxu1 %v122_v60 }
  0x26   :  { %216 = vmatpush.msrb.mxu0 %v105_v63 }
  0x27   :  { %236 = vmatpush.msrb.mxu1 %v121_v0 }
  0x28   :  { %217 = vmatpush.msrb.mxu0 %v104_v3 }
  0x29   :  { %237 = vmatpush.msrb.mxu1 %v120_v4 }
  0x2a   :  { %10 = vsyncpa [#allocation3], 0  ;;  %v102_v11 = vld [vmem:[%s1083_s1 + $0x250] sm:$0xff]  ;;  %189 = vmatpush.msra.mxu2 %v60_v5  ;;  %208 = vmatpush.msra.mxu3 %v77_v6  ;;  %v125_v13 = vld [vmem:[%s1083_s1 + $0x308] sm:$0xff]  ;;  %vm130_vm0 = vcmask 130048   ;;  %vm347_vm1 = vcmask 523264  }
  0x2b   :  { %v118_v12 = vld [vmem:[%s1083_s1 + $0x2d0] sm:$0xff]  ;;  %218 = vmatpush.msrb.mxu0 %v103_v7  ;;  %238 = vmatpush.msrb.mxu1 %v119_v8  ;;  %v21_v14 = vld [vmem:[%s1082_s0] sm:$0xff]  ;;  %v101_v15 = vld [vmem:[%s1083_s1 + $0x248] sm:$0xff]  ;;  %s505_s12 = sshll.u32 %s1087_s5, 4  ;;  %s506_s12 = int_to_ptr.hbm [resolvable:$true] %s505_s12 }
  0x2c   :  { %v117_v16 = vld [vmem:[%s1083_s1 + $0x2c8] sm:$0xff]  ;;  %190 = vmatmul.f32.vlgmr.msra.gmra.mxu2 %v23_v9  ;;  %209 = vmatpush.msra.mxu3 %v76_v10  ;;  %v24_v17 = vld [vmem:[%s1082_s0 + $0x18] sm:$0xff]  ;;  %v100_v19 = vld [vmem:[%s1083_s1 + $0x240] sm:$0xff] }
  0x2d   :  { %219 = vmatpush.msrb.mxu0 %v102_v11  ;;  %239 = vmatpush.msrb.mxu1 %v118_v12  ;;  %v22_v18 = vld [vmem:[%s1082_s0 + $0x8] sm:$0xff]  ;;  %v116_v20 = vld [vmem:[%s1083_s1 + $0x2c0] sm:$0xff]  ;;  %v99_v23 = vld [vmem:[%s1083_s1 + $0x238] sm:$0xff] }
  0x2e   :  { %268 = vmatpush.msrb.mxu2 %v125_v13  ;;  %150 = vmatmul.f32.vlgmr.msra.gmra.mxu0 %v21_v14  ;;  %v124_v21 = vld [vmem:[%s1083_s1 + $0x300] sm:$0xff]  ;;  %v324_v22 = vld [vmem:[%s1085_s3 + $0x188] sm:$0xff]  ;;  %v115_v24 = vld [vmem:[%s1083_s1 + $0x2b8] sm:$0xff] }
  0x2f   :  { %220 = vmatpush.msrb.mxu0 %v101_v15  ;;  %240 = vmatpush.msrb.mxu1 %v117_v16  ;;  %v27_v25 = vld [vmem:[%s1082_s0 + $0x30] sm:$0xff]  ;;  %v310_v29 = vld [vmem:[%s1085_s3 + $0x118] sm:$0xff]  ;;  %v97_v31 = vld [vmem:[%s1083_s1 + $0x228] sm:$0xff] }
  0x30   :  { %210 = vmatmul.f32.vlgmr.msra.gmra.mxu3 %v24_v17  ;;  %170 = vmatmul.f32.vlgmr.msra.gmra.mxu1 %v22_v18  ;;  %v317_v26 = vld [vmem:[%s1085_s3 + $0x150] sm:$0xff]  ;;  %v113_v32 = vld [vmem:[%s1083_s1 + $0x2a8] sm:$0xff]  ;;  %v303_v33 = vld [vmem:[%s1085_s3 + $0xe0] sm:$0xff] }
  0x31   :  { %221 = vmatpush.msrb.mxu0 %v100_v19  ;;  %241 = vmatpush.msrb.mxu1 %v116_v20  ;;  %v98_v27 = vld [vmem:[%s1083_s1 + $0x230] sm:$0xff]  ;;  %v318_v34 = vld [vmem:[%s1085_s3 + $0x158] sm:$0xff]  ;;  %v96_v35 = vld [vmem:[%s1083_s1 + $0x220] sm:$0xff] }
  0x32   :  { %v114_v28 = vld [vmem:[%s1083_s1 + $0x2b0] sm:$0xff]  ;;  %269 = vmatpush.msrb.mxu2 %v124_v21  ;;  %359 = vmatpush.msrb.mxu3 %v324_v22  ;;  %v112_v36 = vld [vmem:[%s1083_s1 + $0x2a0] sm:$0xff]  ;;  %v296_v37 = vld [vmem:[%s1085_s3 + $0xa8] sm:$0xff] }
  0x33   :  { %222 = vmatpush.msrb.mxu0 %v99_v23  ;;  %242 = vmatpush.msrb.mxu1 %v115_v24  ;;  %v325_v30 = vld [vmem:[%s1085_s3 + $0x190] sm:$0xff]  ;;  %v311_v38 = vld [vmem:[%s1085_s3 + $0x120] sm:$0xff]  ;;  %v95_v39 = vld [vmem:[%s1083_s1 + $0x218] sm:$0xff] }
  0x34   :  { %514 = vmatmul.msk.f32.vlgmr.msrb.gmra.mxu2 %vm130_vm0, %v27_v25  ;;  %360 = vmatpush.msrb.mxu3 %v317_v26  ;;  %v111_v40 = vld [vmem:[%s1083_s1 + $0x298] sm:$0xff]  ;;  %v289_v41 = vld [vmem:[%s1085_s3 + $0x70] sm:$0xff]  ;;  %v93_v44 = vld [vmem:[%s1083_s1 + $0x208] sm:$0xff] }
  0x35   :  { %223 = vmatpush.msrb.mxu0 %v98_v27  ;;  %243 = vmatpush.msrb.mxu1 %v114_v28  ;;  %v94_v42 = vld [vmem:[%s1083_s1 + $0x210] sm:$0xff]  ;;  %v109_v45 = vld [vmem:[%s1083_s1 + $0x288] sm:$0xff]  ;;  %v92_v46 = vld [vmem:[%s1083_s1 + $0x200] sm:$0xff] }
  0x36   :  { %361 = vmatpush.msrb.mxu3 %v310_v29  ;;  %379 = vmatpush.msra.mxu2 %v325_v30  ;;  %v110_v43 = vld [vmem:[%s1083_s1 + $0x290] sm:$0xff]  ;;  %v108_v47 = vld [vmem:[%s1083_s1 + $0x280] sm:$0xff]  ;;  %v26_v49 = vld [vmem:[%s1082_s0 + $0x28] sm:$0xff] }
  0x37   :  { %224 = vmatpush.msrb.mxu0 %v97_v31  ;;  %244 = vmatpush.msrb.mxu1 %v113_v32  ;;  %v25_v48 = vld [vmem:[%s1082_s0 + $0x20] sm:$0xff]  ;;  %v282_v50 = vld [vmem:[%s1085_s3 + $0x38] sm:$0xff]  ;;  %v304_v51 = vld [vmem:[%s1085_s3 + $0xe8] sm:$0xff] }
  0x38   :  { %362 = vmatpush.msrb.mxu3 %v303_v33  ;;  %380 = vmatpush.msra.mxu2 %v318_v34  ;;  %v275_v52 = vld [vmem:[%s1085_s3] sm:$0xff]  ;;  %v328_v53 = vld [vmem:[%s1085_s3 + $0x1a8] sm:$0xff]  ;;  %v329_v54 = vld [vmem:[%s1085_s3 + $0x1b0] sm:$0xff] }
  0x39   :  { %225 = vmatpush.msrb.mxu0 %v96_v35  ;;  %245 = vmatpush.msrb.mxu1 %v112_v36  ;;  %v297_v55 = vld [vmem:[%s1085_s3 + $0xb0] sm:$0xff]  ;;  %v326_v56 = vld [vmem:[%s1085_s3 + $0x198] sm:$0xff]  ;;  %v319_v60 = vld [vmem:[%s1085_s3 + $0x160] sm:$0xff] }
  0x3a   :  { %363 = vmatpush.msrb.mxu3 %v296_v37  ;;  %381 = vmatpush.msra.mxu2 %v311_v38  ;;  %v321_v57 = vld [vmem:[%s1085_s3 + $0x170] sm:$0xff]  ;;  %v322_v58 = vld [vmem:[%s1085_s3 + $0x178] sm:$0xff]  ;;  %v315_v62 = vld [vmem:[%s1085_s3 + $0x140] sm:$0xff] }
  0x3b   :  { %226 = vmatpush.msrb.mxu0 %v95_v39  ;;  %246 = vmatpush.msrb.mxu1 %v111_v40  ;;  %v290_v59 = vld [vmem:[%s1085_s3 + $0x78] sm:$0xff]  ;;  %v283_v63 = vld [vmem:[%s1085_s3 + $0x40] sm:$0xff]  ;;  %v312_v0 = vld [vmem:[%s1085_s3 + $0x128] sm:$0xff] }
  0x3c   :  { %364 = vmatpush.msrb.mxu3 %v289_v41  ;;  %382 = vmatpush.msra.mxu2 %v304_v51  ;;  %v314_v61 = vld [vmem:[%s1085_s3 + $0x138] sm:$0xff]  ;;  %v307_v1 = vld [vmem:[%s1085_s3 + $0x100] sm:$0xff]  ;;  %v308_v2 = vld [vmem:[%s1085_s3 + $0x108] sm:$0xff] }
  0x3d   :  { %227 = vmatpush.msrb.mxu0 %v94_v42  ;;  %247 = vmatpush.msrb.mxu1 %v110_v43  ;;  %v276_v3 = vld [vmem:[%s1085_s3 + $0x8] sm:$0xff]  ;;  %v305_v4 = vld [vmem:[%s1085_s3 + $0xf0] sm:$0xff]  ;;  %v327_v5 = vld [vmem:[%s1085_s3 + $0x1a0] sm:$0xff] }
  0x3e   :  { %365 = vmatpush.msrb.mxu3 %v282_v50  ;;  %383 = vmatpush.msra.mxu2 %v297_v55  ;;  %v300_v6 = vld [vmem:[%s1085_s3 + $0xc8] sm:$0xff]  ;;  %v301_v7 = vld [vmem:[%s1085_s3 + $0xd0] sm:$0xff]  ;;  %v298_v8 = vld [vmem:[%s1085_s3 + $0xb8] sm:$0xff] }
  0x3f   :  { %228 = vmatpush.msrb.mxu0 %v93_v44  ;;  %248 = vmatpush.msrb.mxu1 %v109_v45  ;;  %v320_v9 = vld [vmem:[%s1085_s3 + $0x168] sm:$0xff]  ;;  %v293_v10 = vld [vmem:[%s1085_s3 + $0x90] sm:$0xff]  ;;  %v294_v11 = vld [vmem:[%s1085_s3 + $0x98] sm:$0xff] }
  0x40   :  { %366 = vmatpush.msrb.mxu3 %v275_v52  ;;  %384 = vmatpush.msra.mxu2 %v290_v59  ;;  %v291_v12 = vld [vmem:[%s1085_s3 + $0x80] sm:$0xff]  ;;  %v313_v13 = vld [vmem:[%s1085_s3 + $0x130] sm:$0xff]  ;;  %v286_v14 = vld [vmem:[%s1085_s3 + $0x58] sm:$0xff] }
  0x41   :  { %229 = vmatpush.msrb.mxu0 %v92_v46  ;;  %249 = vmatpush.msrb.mxu1 %v108_v47  ;;  %v287_v15 = vld [vmem:[%s1085_s3 + $0x60] sm:$0xff]  ;;  %v284_v16 = vld [vmem:[%s1085_s3 + $0x48] sm:$0xff]  ;;  %v306_v17 = vld [vmem:[%s1085_s3 + $0xf8] sm:$0xff] }
  0x42   :  { %230 = vmatmul.f32.vlgmr.msrb.gmra.mxu0 %v25_v48  ;;  %250 = vmatmul.f32.vlgmr.msrb.gmra.mxu1 %v26_v49  ;;  %v279_v18 = vld [vmem:[%s1085_s3 + $0x20] sm:$0xff]  ;;  %v280_v19 = vld [vmem:[%s1085_s3 + $0x28] sm:$0xff]  ;;  %v277_v20 = vld [vmem:[%s1085_s3 + $0x10] sm:$0xff] }
  0x43   :  { %439 = vmatpush.msra.mxu0 %v328_v53  ;;  %459 = vmatpush.msra.mxu1 %v329_v54  ;;  %v299_v21 = vld [vmem:[%s1085_s3 + $0xc0] sm:$0xff]  ;;  %v292_v22 = vld [vmem:[%s1085_s3 + $0x88] sm:$0xff]  ;;  %v285_v24 = vld [vmem:[%s1085_s3 + $0x50] sm:$0xff] }
  0x44   :  { %399 = vmatpush.msra.mxu3 %v326_v56  ;;  %385 = vmatpush.msra.mxu2 %v283_v63  ;;  %v523_v23 = vld [vmem:[%s1084_s2] ss:$0 sm:$0xff]  ;;  %v278_v26 = vld [vmem:[%s1085_s3 + $0x18] sm:$0xff]  ;;  %v316_v43 = vld [vmem:[%s1085_s3 + $0x148] sm:$0xff] }
  0x45   :  { %440 = vmatpush.msra.mxu0 %v321_v57  ;;  %460 = vmatpush.msra.mxu1 %v322_v58  ;;  %v330_v41 = vld [vmem:[%s1085_s3 + $0x1b8] sm:$0xff]  ;;  %v323_v42 = vld [vmem:[%s1085_s3 + $0x180] sm:$0xff]  ;;  %v309_v44 = vld [vmem:[%s1085_s3 + $0x110] sm:$0xff] }
  0x46   :  { %400 = vmatpush.msra.mxu3 %v319_v60  ;;  %386 = vmatpush.msra.mxu2 %v276_v3  ;;  %v302_v45 = vld [vmem:[%s1085_s3 + $0xd8] sm:$0xff]  ;;  %v295_v46 = vld [vmem:[%s1085_s3 + $0xa0] sm:$0xff]  ;;  %v288_v47 = vld [vmem:[%s1085_s3 + $0x68] sm:$0xff] }
  0x47   :  { %441 = vmatpush.msra.mxu0 %v314_v61  ;;  %461 = vmatpush.msra.mxu1 %v315_v62  ;;  %v281_v48 = vld [vmem:[%s1085_s3 + $0x30] sm:$0xff]  ;;  %v331_v49 = vld [vmem:[%s1086_s4] sm:$0x7f]  ;;  %s550_s3 = smov [#allocation2]  }
  0x48   :  { %401 = vmatpush.msra.mxu3 %v312_v0  ;;  %419 = vmatpush.msrb.mxu2 %v327_v5  ;;  %v337_v50 = vperm.slane %v331_v49, 4  ;;  %v338_v51 = vperm.slane %v331_v49, 5  ;;  %v333_v56 = vperm.slane %v331_v49, 0  ;;  %v334_v57 = vperm.slane %v331_v49, 1  ;;  %s503_s4 = sshll.u32 %s550_s3, 4  ;;  %s504_s4 = int_to_ptr.vmem [resolvable:$true] %s503_s4 }
  0x49   :  { %442 = vmatpush.msra.mxu0 %v307_v1  ;;  %462 = vmatpush.msra.mxu1 %v308_v2  ;;  %v336_v62 = vperm.slane %v331_v49, 3  ;;  %v335_v63 = vperm.slane %v331_v49, 2 }
  0x4a   :  { %402 = vmatpush.msra.mxu3 %v305_v4  ;;  %420 = vmatpush.msrb.mxu2 %v320_v9  ;;  %v339_v4 = vperm.slane %v331_v49, 6 }
  0x4b   :  { %443 = vmatpush.msra.mxu0 %v300_v6  ;;  %463 = vmatpush.msra.mxu1 %v301_v7 }
  0x4c   :  { %403 = vmatpush.msra.mxu3 %v298_v8  ;;  %421 = vmatpush.msrb.mxu2 %v313_v13 }
  0x4d   :  { %444 = vmatpush.msra.mxu0 %v293_v10  ;;  %464 = vmatpush.msra.mxu1 %v294_v11 }
  0x4e   :  { %404 = vmatpush.msra.mxu3 %v291_v12  ;;  %422 = vmatpush.msrb.mxu2 %v306_v17 }
  0x4f   :  { %445 = vmatpush.msra.mxu0 %v286_v14  ;;  %465 = vmatpush.msra.mxu1 %v287_v15 }
  0x50   :  { %405 = vmatpush.msra.mxu3 %v284_v16  ;;  %423 = vmatpush.msrb.mxu2 %v299_v21 }
  0x51   :  { %446 = vmatpush.msra.mxu0 %v279_v18  ;;  %466 = vmatpush.msra.mxu1 %v280_v19 }
  0x52   :  { %406 = vmatpush.msra.mxu3 %v277_v20  ;;  %424 = vmatpush.msrb.mxu2 %v292_v22 }
  0x54   :  { %425 = vmatpush.msrb.mxu2 %v285_v24 }
  0x56   :  { %426 = vmatpush.msrb.mxu2 %v278_v26 }
  0xab   :  { %v151_v25 = vpop.f32.mrf.mxu0 }
  0xac   :  { %v152_v27 = vadd.f32 %v523_v23, %v151_v25 }
  0xad   :  { %v171_v28 = vpop.f32.mrf.mxu1 }
  0xae   :  { %v172_v29 = vadd.f32 %v171_v28, %v152_v27 }
  0xaf   :  { %v191_v30 = vpop.f32.mrf.mxu2 }
  0xb0   :  { %v192_v31 = vadd.f32 %v191_v30, %v172_v29 }
  0xb3   :  { %v211_v32 = vpop.f32.mrf.mxu3 }
  0xb4   :  { %v212_v33 = vadd.f32 %v211_v32, %v192_v31 }
  0xb7   :  { %v271_v37 = vpop.f32.mrf.mxu2 }
  0xbf   :  { %v231_v34 = vpop.f32.mrf.mxu0  ;;  %v251_v35 = vpop.f32.mrf.mxu1 }
  0xc0   :  { %v232_v36 = vadd.f32 %v231_v34, %v212_v33 }
  0xc2   :  { %v252_v38 = vadd.f32 %v251_v35, %v232_v36 }
  0xc4   :  { %v272_v39 = vadd.f32 %v271_v37, %v252_v38 }
  0xc6   :  { %v274_v40 = vmax.f32 %v272_v39, 0.0 }
  0xc8   :  { %515 = vmatmul.msk.f32.vlgmr.msrb.gmra.mxu3 %vm347_vm1, %v274_v40  ;;  %516 = vmatmul.msk.f32.vlgmr.msra.gmra.mxu2 %vm347_vm1, %v274_v40 }
  0xc9   :  { %519 = vmatmul.msk.f32.vlgmr.msra.gmra.mxu0 %vm347_vm1, %v274_v40  ;;  %520 = vmatmul.msk.f32.vlgmr.msra.gmra.mxu1 %vm347_vm1, %v274_v40 }
  0xca   :  { %479 = vmatpush.msrb.mxu3 %v330_v41 }
  0xcc   :  { %480 = vmatpush.msrb.mxu3 %v323_v42 }
  0xce   :  { %481 = vmatpush.msrb.mxu3 %v316_v43 }
  0xd0   :  { %482 = vmatpush.msrb.mxu3 %v309_v44  ;;  %518 = vmatmul.msk.f32.vlgmr.msrb.gmra.mxu2 %vm347_vm1, %v274_v40 }
  0xd1   :  { %517 = vmatmul.msk.f32.vlgmr.msra.gmra.mxu3 %vm347_vm1, %v274_v40 }
  0xd2   :  { %483 = vmatpush.msrb.mxu3 %v302_v45 }
  0xd4   :  { %484 = vmatpush.msrb.mxu3 %v295_v46 }
  0xd6   :  { %485 = vmatpush.msrb.mxu3 %v288_v47 }
  0xd8   :  { %486 = vmatpush.msrb.mxu3 %v281_v48 }
  0xd9   :  { %521 = vmatmul.msk.f32.vlgmr.msrb.gmra.mxu3 %vm347_vm1, %v274_v40 }
 0x146   :  { %v448_v52 = vpop.f32.mrf.mxu0  ;;  %v468_v53 = vpop.f32.mrf.mxu1 }
 0x147   :  { %v449_v54 = vadd.f32 %v448_v52, %v337_v50  ;;  %v469_v55 = vadd.f32 %v468_v53, %v338_v51 }
 0x149   :  { %495 = vst [vmem:[#allocation2 + $0x20] sm:$0xff] %v449_v54 }
 0x14a   :  { %496 = vst [vmem:[#allocation2 + $0x28] sm:$0xff] %v469_v55 }
 0x14b   :  { %v368_v58 = vpop.f32.mrf.mxu3  ;;  %v388_v59 = vpop.f32.mrf.mxu2 }
 0x14c   :  { %v369_v60 = vadd.f32 %v368_v58, %v333_v56  ;;  %v389_v61 = vadd.f32 %v388_v59, %v334_v57 }
 0x14e   :  { %491 = vst [vmem:[#allocation2] sm:$0xff] %v369_v60 }
 0x14f   :  { %492 = vst [vmem:[#allocation2 + $0x8] sm:$0xff] %v389_v61 }
 0x153   :  { %v428_v0 = vpop.f32.mrf.mxu2 }
 0x154   :  { %v408_v1 = vpop.f32.mrf.mxu3  ;;  %v429_v2 = vadd.f32 %v428_v0, %v336_v62 }
 0x155   :  { %v409_v3 = vadd.f32 %v408_v1, %v335_v63 }
 0x156   :  { %494 = vst [vmem:[#allocation2 + $0x18] sm:$0xff] %v429_v2 }
 0x157   :  { %493 = vst [vmem:[#allocation2 + $0x10] sm:$0xff] %v409_v3 }
 0x15c   :  { %v488_v5 = vpop.f32.mrf.mxu3 }
 0x15d   :  { %v489_v6 = vadd.f32 %v488_v5, %v339_v4 }
 0x15f   :  { %497 = vst.msk [vmem:[#allocation2 + $0x30] sm:$0xff] %vm130_vm0, %v489_v6 }
 0x160   :  { %508 = dma.vmem_to_hbm [thread:$0]  %s504_s4, 896, %s506_s12, [#allocation3]  }
 0x161   :  { %548 = dma.done.wait [#allocation3], 896  }
 0x162   :  { %549 = vsyncadd [#allocation3], 4294966400 }
 0x163   :  { %513 = vsyncpa [#allocation3], 1 }

</bundles_post_ra>
